<compile_context>
chip_gen: v5e
topology: v5e:2x2
jax: 0.10.0
libtpu: 0.0.40
codegen_flags: <defaults>
</compile_context>

<pallas_src>
import functools

import jax
import jax.numpy as jnp
from jax.experimental import pallas as pl
from jax.experimental.pallas import tpu as pltpu

_LANE = 128
_CP = 128                       # padded output-feature width (lane-dense stores)
_TM_TARGET = 512                # row-tile target
_TK_TARGET = 1024               # reduction-tile target (over 2*Np)
_VMEM_LIMIT = 32 * 1024 * 1024  # safe on v5e / v6e / v7x


def _round_up(x, m):
    return (x + m - 1) // m * m


def _choose_tiles(num_nodes):
    """Padded node count Np, row tile TM, reduction tile TK (over 2*Np)."""
    np_ = _round_up(max(num_nodes, 8), _LANE)
    if np_ >= _TM_TARGET:
        np_ = _round_up(np_, _TM_TARGET)
        tm = _TM_TARGET
    else:
        tm = np_
    tk = min(_TK_TARGET, 2 * np_)
    assert np_ % tm == 0 and (2 * np_) % tk == 0
    return np_, tm, tk


# ----------------------------------------------------------------------------
# Kernel 1: fused per-layer feature transform  H_all = X @ [W0 | W1 | Wroot]
# ----------------------------------------------------------------------------
def _feature_kernel(x_ref, w_ref, o_ref):
    o_ref[...] = jnp.dot(
        x_ref[...], w_ref[...], preferred_element_type=jnp.float32
    ).astype(o_ref.dtype)


# ----------------------------------------------------------------------------
# Kernel 2: tiled spline aggregation  out = Acat @ Hcat + (root + bias)
#           with fused activation at the last reduction step.
# ----------------------------------------------------------------------------
def _agg_kernel(a_ref, h_ref, r_ref, o_ref, acc_ref, *, activation, valid_cols):
    k = pl.program_id(1)

    @pl.when(k == 0)
    def _():
        acc_ref[...] = jnp.zeros_like(acc_ref)

    acc_ref[...] += jnp.dot(
        a_ref[...], h_ref[...], preferred_element_type=jnp.float32
    )

    @pl.when(k == pl.num_programs(1) - 1)
    def _():
        out = acc_ref[...] + r_ref[...]
        if activation == "elu":
            # padded columns are exactly 0 -> elu(0) = 0, so no mask needed.
            out = jnp.where(out > 0, out, jnp.expm1(out))
        elif activation == "log_softmax":
            # mask padded lanes out of the softmax normalization
            col = jax.lax.broadcasted_iota(jnp.int32, out.shape, 1)
            masked = jnp.where(col < valid_cols, out, jnp.float32(-1e30))
            m = jnp.max(masked, axis=-1, keepdims=True)
            s = masked - m
            lse = jnp.log(jnp.sum(jnp.exp(s), axis=-1, keepdims=True))
            out = s - lse
        o_ref[...] = out.astype(o_ref.dtype)


# ----------------------------------------------------------------------------
# One SplineConv layer (+ fused activation) on padded, lane-dense arrays.
# ----------------------------------------------------------------------------
def spline_conv_layer(x_p, a_cat, w_cat, bias_p, activation, valid_cols, tm, tk):
    np_, fp = x_p.shape
    cp = _CP
    kp = 2 * np_

    # -- feature transform: H_all = X @ [W0 | W1 | Wroot]  (tiny, row-tiled)
    h_all = pl.pallas_call(
        _feature_kernel,
        out_shape=jax.ShapeDtypeStruct((np_, 3 * cp), jnp.float32),
        grid=(np_ // tm,),
        in_specs=[
            pl.BlockSpec((tm, fp), lambda i: (i, 0)),
            pl.BlockSpec((fp, 3 * cp), lambda i: (0, 0)),
        ],
        out_specs=pl.BlockSpec((tm, 3 * cp), lambda i: (i, 0)),
        compiler_params=pltpu.CompilerParams(
            dimension_semantics=("parallel",),
            vmem_limit_bytes=_VMEM_LIMIT,
        ),
    )(x_p, w_cat)

    # stack H0;H1 along the contraction axis (matches Acat = [A0 | A1]); bf16
    h_cat = jnp.concatenate(
        [h_all[:, :cp], h_all[:, cp:2 * cp]], axis=0
    ).astype(jnp.bfloat16)
    # root transform + bias stays in f32
    r = h_all[:, 2 * cp:] + bias_p[None, :]

    # -- aggregation: stream Acat tiles, accumulate in f32 VMEM scratch
    out = pl.pallas_call(
        functools.partial(_agg_kernel, activation=activation,
                          valid_cols=valid_cols),
        out_shape=jax.ShapeDtypeStruct((np_, cp), jnp.float32),
        grid=(np_ // tm, kp // tk),
        in_specs=[
            pl.BlockSpec((tm, tk), lambda i, k: (i, k)),   # Acat tile (bf16)
            pl.BlockSpec((tk, cp), lambda i, k: (k, 0)),   # Hcat k-slice (bf16)
            pl.BlockSpec((tm, cp), lambda i, k: (i, 0)),   # root + bias (f32)
        ],
        out_specs=pl.BlockSpec((tm, cp), lambda i, k: (i, 0)),
        scratch_shapes=[pltpu.VMEM((tm, cp), jnp.float32)],
        compiler_params=pltpu.CompilerParams(
            dimension_semantics=("parallel", "arbitrary"),
            vmem_limit_bytes=_VMEM_LIMIT,
        ),
    )(a_cat, h_cat, r)
    return out


# ----------------------------------------------------------------------------
# Glue: dense, degree-normalized, spline-weighted adjacency  Acat = [A0 | A1]
# ----------------------------------------------------------------------------
def build_spline_adjacency(edge_index, edge_attr, padded_nodes):
    src = edge_index[0]                 # source nodes (messages x_j)
    dst = edge_index[1]                 # target nodes (aggregation index)
    u = jnp.clip(edge_attr[:, 0].astype(jnp.float32), 0.0, 1.0)
    b0 = 1.0 - u
    b1 = u

    deg = jnp.zeros((padded_nodes,), jnp.float32).at[dst].add(1.0)
    inv_deg = jnp.where(deg > 0, 1.0 / deg, 0.0)

    a = jnp.zeros((padded_nodes, 2 * padded_nodes), jnp.float32)
    a = a.at[dst, src].add(b0)                      # A0 block
    a = a.at[dst, src + padded_nodes].add(b1)       # A1 block
    a = a * inv_deg[:, None]                        # mean aggregation
    return a.astype(jnp.bfloat16)


# ----------------------------------------------------------------------------
# Params + padding helpers
# ----------------------------------------------------------------------------
def init_splinenet_params(key, num_features, num_classes, hidden=16):
    def layer(k, fin, fout):
        k0, k1, k2, k3 = jax.random.split(k, 4)
        scale = 1.0 / jnp.sqrt(jnp.float32(fin))
        return dict(
            w0=jax.random.normal(k0, (fin, fout), jnp.float32) * scale,
            w1=jax.random.normal(k1, (fin, fout), jnp.float32) * scale,
            wroot=jax.random.normal(k2, (fin, fout), jnp.float32) * scale,
            bias=jax.random.normal(k3, (fout,), jnp.float32) * 0.01,
        )

    k1, k2 = jax.random.split(key)
    return dict(conv1=layer(k1, num_features, hidden),
                conv2=layer(k2, hidden, num_classes))


def _pad_wcat(p, fin_p, cp):
    fin, cout = p["w0"].shape
    w = jnp.zeros((fin_p, 3 * cp), jnp.float32)
    w = w.at[:fin, 0 * cp:0 * cp + cout].set(p["w0"])
    w = w.at[:fin, 1 * cp:1 * cp + cout].set(p["w1"])
    w = w.at[:fin, 2 * cp:2 * cp + cout].set(p["wroot"])
    b = jnp.zeros((cp,), jnp.float32).at[:cout].set(p["bias"])
    return w, b


# ----------------------------------------------------------------------------
# SplineNet forward
# ----------------------------------------------------------------------------
def splinenet_forward(params, x, edge_index, edge_attr, num_classes, hidden=16):
    n, f = x.shape
    np_, tm, tk = _choose_tiles(n)
    fp1 = _round_up(f, _LANE)

    a_cat = build_spline_adjacency(edge_index, edge_attr, np_)

    x_p = jnp.zeros((np_, fp1), jnp.float32).at[:n, :f].set(
        x.astype(jnp.float32))

    w1, b1 = _pad_wcat(params["conv1"], fp1, _CP)
    w2, b2 = _pad_wcat(params["conv2"], _CP, _CP)

    # dropout (eval mode) -> identity
    h = spline_conv_layer(x_p, a_cat, w1, b1, "elu", hidden, tm, tk)
    # dropout (eval mode) -> identity
    out_p = spline_conv_layer(h, a_cat, w2, b2, "log_softmax", num_classes,
                              tm, tk)
    return out_p[:n, :num_classes]


# ----------------------------------------------------------------------------
# Pure-JAX reference (f32, edge-scatter formulation) for validation
# ----------------------------------------------------------------------------
def _reference_forward(params, x, edge_index, edge_attr, num_classes, hidden=16):
    src, dst = edge_index[0], edge_index[1]
    u = jnp.clip(edge_attr[:, 0].astype(jnp.float32), 0.0, 1.0)
    n = x.shape[0]
    deg = jnp.zeros((n,), jnp.float32).at[dst].add(1.0)
    inv = jnp.where(deg > 0, 1.0 / deg, 0.0)

    def layer(xx, p):
        h0 = xx @ p["w0"]
        h1 = xx @ p["w1"]
        root = xx @ p["wroot"]
        msg = (1.0 - u)[:, None] * h0[src] + u[:, None] * h1[src]
        agg = jnp.zeros((n, h0.shape[1]), jnp.float32).at[dst].add(msg)
        return agg * inv[:, None] + root + p["bias"][None, :]

    h = jax.nn.elu(layer(x.astype(jnp.float32), params["conv1"]))
    o = layer(h, params["conv2"])
    return jax.nn.log_softmax(o, axis=1)


# ----------------------------------------------------------------------------
if __name__ == "__main__":
    num_nodes = 8
    num_features = 4
    num_classes = 3
    num_edges = 16
    hidden = 16

    key = jax.random.PRNGKey(0)
    kx, ke, ka, kp = jax.random.split(key, 4)

    x = jax.random.normal(kx, (num_nodes, num_features), jnp.float32)
    edge_index = jax.random.randint(ke, (2, num_edges), 0, num_nodes,
                                    dtype=jnp.int32)
    edge_attr = jax.random.uniform(ka, (num_edges, 1), jnp.float32,
                                   minval=0.0, maxval=0.999)

    params = init_splinenet_params(kp, num_features, num_classes, hidden)

    out = splinenet_forward(params, x, edge_index, edge_attr,
                            num_classes=num_classes, hidden=hidden)
    out = jax.block_until_ready(out)

    assert out.shape == (num_nodes, num_classes)
    assert bool(jnp.all(jnp.isfinite(out)))
    # rows of log_softmax should exp-sum to ~1
    assert bool(jnp.allclose(jnp.sum(jnp.exp(out), axis=1), 1.0, atol=1e-3))

    # validate against pure-JAX f32 reference (Acat/Hcat are bf16 -> loose tol)
    ref = _reference_forward(params, x, edge_index, edge_attr,
                             num_classes=num_classes, hidden=hidden)
    max_err = float(jnp.max(jnp.abs(out - ref)))
    assert max_err < 0.1, f"mismatch vs reference: max_err={max_err}"

    print("KERNEL_OK")
</pallas_src>

<mosaic_0001>
module attributes {stable_mosaic.version = 11 : i64} {
  func.func @_feature_kernel(%arg0: i32, %arg1: memref<128x128xf32, #tpu.memory_space<vmem>>, %arg2: memref<128x384xf32, #tpu.memory_space<vmem>>, %arg3: memref<128x384xf32, #tpu.memory_space<vmem>>) attributes {dimension_semantics = [#tpu.dimension_semantics<parallel>], iteration_bounds = array<i64: 1>, scalar_prefetch = 0 : i64, scratch_operands = 0 : i64, tpu.core_type = #tpu.core_type<tc>, window_params = [{transform_indices = @transform_0, window_bounds = array<i64: 128, 128>}, {pipeline_mode = #tpu.pipeline_mode<synchronous>, transform_indices = @transform_1, window_bounds = array<i64: 128, 384>}, {transform_indices = @transform_2, window_bounds = array<i64: 128, 384>}]} {
    %c0 = arith.constant 0 : index
    %c0_0 = arith.constant 0 : index
    %0 = vector.load %arg1[%c0, %c0_0] : memref<128x128xf32, #tpu.memory_space<vmem>>, vector<128x128xf32>
    %c0_1 = arith.constant 0 : index
    %c0_2 = arith.constant 0 : index
    %1 = vector.load %arg2[%c0_1, %c0_2] : memref<128x384xf32, #tpu.memory_space<vmem>>, vector<128x384xf32>
    %cst = arith.constant dense<0.000000e+00> : vector<128x384xf32>
    %2 = tpu.matmul %0, %1, %cst {dimension_numbers = #tpu.dot_dimension_numbers<[1], [0], [0], [1], [0, 0, 1, 1], [], []>} : vector<128x128xf32>, vector<128x384xf32>, vector<128x384xf32> -> vector<128x384xf32>
    %c0_3 = arith.constant 0 : index
    %c0_4 = arith.constant 0 : index
    %3 = vector.load %arg3[%c0_3, %c0_4] : memref<128x384xf32, #tpu.memory_space<vmem>>, vector<128x384xf32>
    tpu.vector_store %arg3[%c0_3, %c0_4], %2 {strides = array<i32>} : memref<128x384xf32, #tpu.memory_space<vmem>>, vector<128x384xf32>,
    return
  }
  func.func @transform_0(%arg0: i32) -> (i32, i32) {
    %c0_i32 = arith.constant 0 : i32
    %c0_i32_0 = arith.constant 0 : i32
    return %arg0, %c0_i32 : i32, i32
  }
  func.func @transform_1(%arg0: i32) -> (i32, i32) {
    %c0_i32 = arith.constant 0 : i32
    %c0_i32_0 = arith.constant 0 : i32
    %c0_i32_1 = arith.constant 0 : i32
    return %c0_i32, %c0_i32_0 : i32, i32
  }
  func.func @transform_2(%arg0: i32) -> (i32, i32) {
    %c0_i32 = arith.constant 0 : i32
    %c0_i32_0 = arith.constant 0 : i32
    return %arg0, %c0_i32 : i32, i32
  }
}

</mosaic_0001>

<bundles_post_ra>
// kernel: tpu_custom_call.1
= control target key start
LH: loop header
LB: loop body
LE: loop exit
PB: predicated region body
PF: predicated region fallthrough
CT: control target
= control target key end

     0   :  { %7 = vsyncpa [#allocation3], 0  ;;  %s669_s0 = inlined_call_operand.hbm [shape: f32[128,128], index: 0, kind: input, shape index: {}]   ;;  %s670_s1 = inlined_call_operand.hbm [shape: f32[128,384], index: 1, kind: input, shape index: {}]   ;;  %s671_s2 = inlined_call_operand.hbm [shape: f32[128,384], index: 2, kind: output, shape index: {}]  }
   0x1   :  { %8 = vsyncpa [#allocation6], 0 }
   0x2   :  { %9 = vsyncpa [#allocation4], 0  ;;  %s14_s11 = sshll.u32 %s669_s0, 4  ;;  %s504_s12 = smov [#allocation2]   ;;  %s15_s11 = int_to_ptr.hbm [resolvable:$true] %s14_s11 }
   0x3   :  { %s16_s13 = sshll.u32 %s504_s12, 4  ;;  %s27_s16 = sshll.u32 %s670_s1, 4  ;;  %s17_s13 = int_to_ptr.vmem [resolvable:$true] %s16_s13  ;;  %s28_s16 = int_to_ptr.hbm [resolvable:$true] %s27_s16 }
   0x4   :  { %s505_s17 = smov 128   ;;  %s506_s18 = smov 8  }
   0x5   :  { %22 = dma.hbm_to_vmem [thread:$0]  %s15_s11, 2048, %s17_s13, [#allocation3], %s505_s17, %s505_s17, %s506_s18  }
   0x6   :  { %s507_s19 = smov [#allocation5]   ;;  %s508_s21 = smov 384  }
   0x7   :  { %s29_s20 = sshll.u32 %s507_s19, 4  ;;  %s509_s22 = smov 24   ;;  %s30_s20 = int_to_ptr.vmem [resolvable:$true] %s29_s20 }
   0x8   :  { %35 = dma.hbm_to_vmem [thread:$0]  %s28_s16, 6144, %s30_s20, [#allocation6], %s508_s21, %s508_s21, %s509_s22  }
   0x9   :  { %498 = dma.done.wait [#allocation3], 2048  }
   0xa   :  { %499 = vsyncadd [#allocation3], 4294965248 }
   0xb   :  { %500 = dma.done.wait [#allocation6], 6144  }
   0xc   :  { %501 = vsyncadd [#allocation6], 4294961152  ;;  %v105_v0 = vld [vmem:[#allocation5 + $0x168] sm:$0xff]  ;;  %v535_v1 = vld [vmem:[#allocation5 + $0x178] sm:$0xff]  ;;  %s510_s0 = smov [#allocation7]   ;;  %s357_s25 = sshll.u32 %s671_s2, 4  ;;  %s358_s25 = int_to_ptr.hbm [resolvable:$true] %s357_s25 }
   0xd   :  { %v102_v2 = vld [vmem:[#allocation5 + $0x150] sm:$0xff]  ;;  %371 = vmatpush.msra.mxu3 %v105_v0  ;;  %238 = vmatpush.msra.mxu2 %v535_v1  ;;  %v538_v3 = vld [vmem:[#allocation5 + $0x160] sm:$0xff]  ;;  %v99_v4 = vld [vmem:[#allocation5 + $0x138] sm:$0xff]  ;;  %s355_s1 = sshll.u32 %s510_s0, 4  ;;  %s356_s1 = int_to_ptr.vmem [resolvable:$true] %s355_s1 }
   0xe   :  { %v540_v5 = vld [vmem:[#allocation5 + $0x148] sm:$0xff]  ;;  %108 = vmatpush.msra.mxu0 %v105_v0  ;;  %v542_v6 = vld [vmem:[#allocation5 + $0x170] sm:$0xff]  ;;  %v545_v7 = vld [vmem:[#allocation5 + $0x158] sm:$0xff] }
   0xf   :  { %372 = vmatpush.msra.mxu3 %v102_v2  ;;  %239 = vmatpush.msra.mxu2 %v538_v3  ;;  %v96_v8 = vld [vmem:[#allocation5 + $0x120] sm:$0xff]  ;;  %v548_v9 = vld [vmem:[#allocation5 + $0x130] sm:$0xff]  ;;  %v93_v11 = vld [vmem:[#allocation5 + $0x108] sm:$0xff] }
  0x10   :  { %173 = vmatpush.msra.mxu1 %v542_v6  ;;  %109 = vmatpush.msra.mxu0 %v102_v2  ;;  %v551_v10 = vld [vmem:[#allocation5 + $0x140] sm:$0xff]  ;;  %v554_v12 = vld [vmem:[#allocation5 + $0x118] sm:$0xff]  ;;  %v557_v13 = vld [vmem:[#allocation5 + $0x128] sm:$0xff] }
  0x11   :  { %373 = vmatpush.msra.mxu3 %v99_v4  ;;  %240 = vmatpush.msra.mxu2 %v540_v5  ;;  %v90_v14 = vld [vmem:[#allocation5 + $0xf0] sm:$0xff]  ;;  %v560_v15 = vld [vmem:[#allocation5 + $0x100] sm:$0xff]  ;;  %v87_v17 = vld [vmem:[#allocation5 + $0xd8] sm:$0xff] }
  0x12   :  { %174 = vmatpush.msra.mxu1 %v545_v7  ;;  %110 = vmatpush.msra.mxu0 %v99_v4  ;;  %v563_v16 = vld [vmem:[#allocation5 + $0x110] sm:$0xff]  ;;  %v566_v18 = vld [vmem:[#allocation5 + $0xe8] sm:$0xff]  ;;  %v569_v19 = vld [vmem:[#allocation5 + $0xf8] sm:$0xff] }
  0x13   :  { %374 = vmatpush.msra.mxu3 %v96_v8  ;;  %241 = vmatpush.msra.mxu2 %v548_v9  ;;  %v84_v20 = vld [vmem:[#allocation5 + $0xc0] sm:$0xff]  ;;  %v572_v21 = vld [vmem:[#allocation5 + $0xd0] sm:$0xff]  ;;  %v81_v23 = vld [vmem:[#allocation5 + $0xa8] sm:$0xff] }
  0x14   :  { %175 = vmatpush.msra.mxu1 %v551_v10  ;;  %111 = vmatpush.msra.mxu0 %v96_v8  ;;  %v575_v22 = vld [vmem:[#allocation5 + $0xe0] sm:$0xff]  ;;  %v578_v24 = vld [vmem:[#allocation5 + $0xb8] sm:$0xff]  ;;  %v581_v25 = vld [vmem:[#allocation5 + $0xc8] sm:$0xff] }
  0x15   :  { %375 = vmatpush.msra.mxu3 %v93_v11  ;;  %242 = vmatpush.msra.mxu2 %v554_v12  ;;  %v78_v26 = vld [vmem:[#allocation5 + $0x90] sm:$0xff]  ;;  %v584_v27 = vld [vmem:[#allocation5 + $0xa0] sm:$0xff]  ;;  %v75_v29 = vld [vmem:[#allocation5 + $0x78] sm:$0xff] }
  0x16   :  { %176 = vmatpush.msra.mxu1 %v557_v13  ;;  %112 = vmatpush.msra.mxu0 %v93_v11  ;;  %v587_v28 = vld [vmem:[#allocation5 + $0xb0] sm:$0xff]  ;;  %v590_v30 = vld [vmem:[#allocation5 + $0x88] sm:$0xff]  ;;  %v593_v31 = vld [vmem:[#allocation5 + $0x98] sm:$0xff] }
  0x17   :  { %376 = vmatpush.msra.mxu3 %v90_v14  ;;  %243 = vmatpush.msra.mxu2 %v560_v15  ;;  %v72_v32 = vld [vmem:[#allocation5 + $0x60] sm:$0xff]  ;;  %v596_v33 = vld [vmem:[#allocation5 + $0x70] sm:$0xff]  ;;  %v69_v35 = vld [vmem:[#allocation5 + $0x48] sm:$0xff] }
  0x18   :  { %177 = vmatpush.msra.mxu1 %v563_v16  ;;  %113 = vmatpush.msra.mxu0 %v90_v14  ;;  %v599_v34 = vld [vmem:[#allocation5 + $0x80] sm:$0xff]  ;;  %v602_v36 = vld [vmem:[#allocation5 + $0x58] sm:$0xff]  ;;  %v73_v37 = vld [vmem:[#allocation5 + $0x68] sm:$0xff] }
  0x19   :  { %377 = vmatpush.msra.mxu3 %v87_v17  ;;  %244 = vmatpush.msra.mxu2 %v566_v18  ;;  %v66_v38 = vld [vmem:[#allocation5 + $0x30] sm:$0xff]  ;;  %v606_v39 = vld [vmem:[#allocation5 + $0x40] sm:$0xff]  ;;  %v63_v41 = vld [vmem:[#allocation5 + $0x18] sm:$0xff] }
  0x1a   :  { %178 = vmatpush.msra.mxu1 %v569_v19  ;;  %114 = vmatpush.msra.mxu0 %v87_v17  ;;  %v70_v40 = vld [vmem:[#allocation5 + $0x50] sm:$0xff]  ;;  %v609_v42 = vld [vmem:[#allocation5 + $0x28] sm:$0xff]  ;;  %v67_v43 = vld [vmem:[#allocation5 + $0x38] sm:$0xff] }
  0x1b   :  { %378 = vmatpush.msra.mxu3 %v84_v20  ;;  %245 = vmatpush.msra.mxu2 %v572_v21  ;;  %v60_v44 = vld [vmem:[#allocation5] sm:$0xff]  ;;  %v612_v45 = vld [vmem:[#allocation5 + $0x10] sm:$0xff]  ;;  %v61_v49 = vld [vmem:[#allocation5 + $0x8] sm:$0xff] }
  0x1c   :  { %179 = vmatpush.msra.mxu1 %v575_v22  ;;  %115 = vmatpush.msra.mxu0 %v84_v20  ;;  %v615_v46 = vld [vmem:[#allocation2 + $0x60] sm:$0xff]  ;;  %v622_v50 = vld [vmem:[#allocation2 + $0x68] sm:$0xff]  ;;  %v629_v52 = vld [vmem:[#allocation2 + $0x70] sm:$0xff] }
  0x1d   :  { %379 = vmatpush.msra.mxu3 %v81_v23  ;;  %246 = vmatpush.msra.mxu2 %v578_v24  ;;  %v44_v47 = vld [vmem:[#allocation2] sm:$0xff]  ;;  %v45_v51 = vld [vmem:[#allocation2 + $0x8] sm:$0xff]  ;;  %v46_v53 = vld [vmem:[#allocation2 + $0x10] sm:$0xff] }
  0x1e   :  { %180 = vmatpush.msra.mxu1 %v581_v25  ;;  %116 = vmatpush.msra.mxu0 %v81_v23  ;;  %v64_v48 = vld [vmem:[#allocation5 + $0x20] sm:$0xff]  ;;  %v636_v54 = vld [vmem:[#allocation2 + $0x78] sm:$0xff]  ;;  %v49_v57 = vld [vmem:[#allocation2 + $0x28] sm:$0xff] }
  0x1f   :  { %380 = vmatpush.msra.mxu3 %v78_v26  ;;  %247 = vmatpush.msra.mxu2 %v584_v27  ;;  %v47_v55 = vld [vmem:[#allocation2 + $0x18] sm:$0xff]  ;;  %v48_v56 = vld [vmem:[#allocation2 + $0x20] sm:$0xff]  ;;  %v50_v58 = vld [vmem:[#allocation2 + $0x30] sm:$0xff] }
  0x20   :  { %181 = vmatpush.msra.mxu1 %v587_v28  ;;  %117 = vmatpush.msra.mxu0 %v78_v26  ;;  %v51_v59 = vld [vmem:[#allocation2 + $0x38] sm:$0xff]  ;;  %v52_v60 = vld [vmem:[#allocation2 + $0x40] sm:$0xff]  ;;  %v53_v61 = vld [vmem:[#allocation2 + $0x48] sm:$0xff] }
  0x21   :  { %381 = vmatpush.msra.mxu3 %v75_v29  ;;  %248 = vmatpush.msra.mxu2 %v590_v30  ;;  %v54_v62 = vld [vmem:[#allocation2 + $0x50] sm:$0xff]  ;;  %v55_v63 = vld [vmem:[#allocation2 + $0x58] sm:$0xff] }
  0x22   :  { %182 = vmatpush.msra.mxu1 %v593_v31  ;;  %118 = vmatpush.msra.mxu0 %v75_v29 }
  0x23   :  { %382 = vmatpush.msra.mxu3 %v72_v32  ;;  %249 = vmatpush.msra.mxu2 %v596_v33 }
  0x24   :  { %183 = vmatpush.msra.mxu1 %v599_v34  ;;  %119 = vmatpush.msra.mxu0 %v72_v32 }
  0x25   :  { %383 = vmatpush.msra.mxu3 %v69_v35  ;;  %250 = vmatpush.msra.mxu2 %v602_v36 }
  0x26   :  { %184 = vmatpush.msra.mxu1 %v73_v37  ;;  %120 = vmatpush.msra.mxu0 %v69_v35 }
  0x27   :  { %384 = vmatpush.msra.mxu3 %v66_v38  ;;  %251 = vmatpush.msra.mxu2 %v606_v39 }
  0x28   :  { %185 = vmatpush.msra.mxu1 %v70_v40  ;;  %121 = vmatpush.msra.mxu0 %v66_v38 }
  0x29   :  { %385 = vmatpush.msra.mxu3 %v63_v41  ;;  %252 = vmatpush.msra.mxu2 %v609_v42 }
  0x2a   :  { %186 = vmatpush.msra.mxu1 %v67_v43  ;;  %122 = vmatpush.msra.mxu0 %v63_v41 }
  0x2b   :  { %386 = vmatpush.msra.mxu3 %v60_v44  ;;  %253 = vmatpush.msra.mxu2 %v612_v45 }
  0x2c   :  { %160 = vmatmul.f32.vlgmr.msra.gmra.mxu3 %v615_v46  ;;  %254 = vmatmul.f32.vlgmr.msra.gmra.mxu2 %v44_v47 }
  0x2d   :  { %387 = vmatpush.msrb.mxu3 %v542_v6  ;;  %187 = vmatpush.msra.mxu1 %v64_v48 }
  0x2e   :  { %123 = vmatpush.msra.mxu0 %v60_v44 }
  0x2f   :  { %388 = vmatpush.msrb.mxu3 %v545_v7  ;;  %188 = vmatpush.msra.mxu1 %v61_v49 }
  0x30   :  { %124 = vmatmul.f32.vlgmr.msra.gmra.mxu0 %v44_v47  ;;  %189 = vmatmul.f32.vlgmr.msra.gmra.mxu1 %v44_v47 }
  0x31   :  { %389 = vmatpush.msrb.mxu3 %v551_v10 }
  0x33   :  { %390 = vmatpush.msrb.mxu3 %v557_v13 }
  0x34   :  { %163 = vmatmul.f32.gmra.mxu3 %v622_v50  ;;  %257 = vmatmul.f32.gmra.mxu2 %v45_v51 }
  0x35   :  { %391 = vmatpush.msrb.mxu3 %v563_v16 }
  0x37   :  { %392 = vmatpush.msrb.mxu3 %v569_v19 }
  0x38   :  { %127 = vmatmul.f32.gmra.mxu0 %v45_v51  ;;  %192 = vmatmul.f32.gmra.mxu1 %v45_v51 }
  0x39   :  { %393 = vmatpush.msrb.mxu3 %v575_v22 }
  0x3b   :  { %394 = vmatpush.msrb.mxu3 %v581_v25 }
  0x3c   :  { %166 = vmatmul.f32.gmra.mxu3 %v629_v52  ;;  %260 = vmatmul.f32.gmra.mxu2 %v46_v53 }
  0x3d   :  { %395 = vmatpush.msrb.mxu3 %v587_v28 }
  0x3f   :  { %396 = vmatpush.msrb.mxu3 %v593_v31 }
  0x40   :  { %130 = vmatmul.f32.gmra.mxu0 %v46_v53  ;;  %195 = vmatmul.f32.gmra.mxu1 %v46_v53 }
  0x41   :  { %397 = vmatpush.msrb.mxu3 %v599_v34 }
  0x43   :  { %398 = vmatpush.msrb.mxu3 %v73_v37 }
  0x44   :  { %169 = vmatmul.f32.gmra.mxu3 %v636_v54  ;;  %263 = vmatmul.f32.gmra.mxu2 %v47_v55 }
  0x45   :  { %399 = vmatpush.msrb.mxu3 %v70_v40 }
  0x47   :  { %400 = vmatpush.msrb.mxu3 %v67_v43 }
  0x48   :  { %133 = vmatmul.f32.gmra.mxu0 %v47_v55  ;;  %198 = vmatmul.f32.gmra.mxu1 %v47_v55 }
  0x49   :  { %401 = vmatpush.msrb.mxu3 %v64_v48 }
  0x4b   :  { %402 = vmatpush.msrb.mxu3 %v61_v49 }
  0x4c   :  { %225 = vmatmul.f32.vlgmr.msrb.gmra.mxu3 %v615_v46  ;;  %266 = vmatmul.f32.gmra.mxu2 %v48_v56 }
  0x4d   :  { %403 = vmatpush.msra.mxu3 %v535_v1 }
  0x4f   :  { %404 = vmatpush.msra.mxu3 %v538_v3 }
  0x50   :  { %136 = vmatmul.f32.gmra.mxu0 %v48_v56  ;;  %201 = vmatmul.f32.gmra.mxu1 %v48_v56 }
  0x51   :  { %405 = vmatpush.msra.mxu3 %v540_v5 }
  0x53   :  { %406 = vmatpush.msra.mxu3 %v548_v9 }
  0x54   :  { %228 = vmatmul.f32.gmra.mxu3 %v622_v50  ;;  %269 = vmatmul.f32.gmra.mxu2 %v49_v57 }
  0x55   :  { %407 = vmatpush.msra.mxu3 %v554_v12 }
  0x57   :  { %408 = vmatpush.msra.mxu3 %v560_v15 }
  0x58   :  { %139 = vmatmul.f32.gmra.mxu0 %v49_v57  ;;  %204 = vmatmul.f32.gmra.mxu1 %v49_v57 }
  0x59   :  { %409 = vmatpush.msra.mxu3 %v566_v18 }
  0x5b   :  { %410 = vmatpush.msra.mxu3 %v572_v21 }
  0x5c   :  { %231 = vmatmul.f32.gmra.mxu3 %v629_v52  ;;  %272 = vmatmul.f32.gmra.mxu2 %v50_v58 }
  0x5d   :  { %411 = vmatpush.msra.mxu3 %v578_v24 }
  0x5f   :  { %412 = vmatpush.msra.mxu3 %v584_v27 }
  0x60   :  { %142 = vmatmul.f32.gmra.mxu0 %v50_v58  ;;  %207 = vmatmul.f32.gmra.mxu1 %v50_v58 }
  0x61   :  { %413 = vmatpush.msra.mxu3 %v590_v30 }
  0x63   :  { %414 = vmatpush.msra.mxu3 %v596_v33 }
  0x64   :  { %234 = vmatmul.f32.gmra.mxu3 %v636_v54  ;;  %275 = vmatmul.f32.gmra.mxu2 %v51_v59 }
  0x65   :  { %415 = vmatpush.msra.mxu3 %v602_v36 }
  0x67   :  { %416 = vmatpush.msra.mxu3 %v606_v39 }
  0x68   :  { %145 = vmatmul.f32.gmra.mxu0 %v51_v59  ;;  %210 = vmatmul.f32.gmra.mxu1 %v51_v59 }
  0x69   :  { %417 = vmatpush.msra.mxu3 %v609_v42 }
  0x6b   :  { %418 = vmatpush.msra.mxu3 %v612_v45 }
  0x6c   :  { %278 = vmatmul.f32.gmra.mxu2 %v52_v60  ;;  %290 = vmatmul.f32.vlgmr.msra.gmra.mxu3 %v615_v46 }
  0x70   :  { %148 = vmatmul.f32.gmra.mxu0 %v52_v60  ;;  %213 = vmatmul.f32.gmra.mxu1 %v52_v60 }
  0x74   :  { %281 = vmatmul.f32.gmra.mxu2 %v53_v61  ;;  %293 = vmatmul.f32.gmra.mxu3 %v622_v50 }
  0x78   :  { %151 = vmatmul.f32.gmra.mxu0 %v53_v61  ;;  %216 = vmatmul.f32.gmra.mxu1 %v53_v61 }
  0x7c   :  { %284 = vmatmul.f32.gmra.mxu2 %v54_v62  ;;  %296 = vmatmul.f32.gmra.mxu3 %v629_v52 }
  0x80   :  { %154 = vmatmul.f32.gmra.mxu0 %v54_v62  ;;  %219 = vmatmul.f32.gmra.mxu1 %v54_v62 }
  0x84   :  { %287 = vmatmul.f32.gmra.mxu2 %v55_v63  ;;  %299 = vmatmul.f32.gmra.mxu3 %v636_v54 }
  0x88   :  { %157 = vmatmul.f32.gmra.mxu0 %v55_v63  ;;  %222 = vmatmul.f32.gmra.mxu1 %v55_v63 }
  0xad   :  { %v125_v0 = vpop.f32.mrf.mxu0  ;;  %v190_v1 = vpop.f32.mrf.mxu1 }
  0xae   :  { %303 = vst [vmem:[#allocation7] sm:$0xff] %v125_v0 }
  0xaf   :  { %v161_v2 = vpop.f32.mrf.mxu3  ;;  %304 = vst [vmem:[#allocation7 + $0x8] sm:$0xff] %v190_v1  ;;  %v255_v3 = vpop.f32.mrf.mxu2 }
  0xb0   :  { %339 = vst [vmem:[#allocation7 + $0x120] sm:$0xff] %v161_v2 }
  0xb1   :  { %305 = vst [vmem:[#allocation7 + $0x10] sm:$0xff] %v255_v3 }
  0xb5   :  { %v128_v4 = vpop.f32.mrf.mxu0  ;;  %v193_v5 = vpop.f32.mrf.mxu1 }
  0xb6   :  { %306 = vst [vmem:[#allocation7 + $0x18] sm:$0xff] %v128_v4 }
  0xb7   :  { %v164_v6 = vpop.f32.mrf.mxu3  ;;  %307 = vst [vmem:[#allocation7 + $0x20] sm:$0xff] %v193_v5  ;;  %v258_v7 = vpop.f32.mrf.mxu2 }
  0xb8   :  { %342 = vst [vmem:[#allocation7 + $0x138] sm:$0xff] %v164_v6 }
  0xb9   :  { %308 = vst [vmem:[#allocation7 + $0x28] sm:$0xff] %v258_v7 }
  0xbd   :  { %v131_v8 = vpop.f32.mrf.mxu0  ;;  %v196_v9 = vpop.f32.mrf.mxu1 }
  0xbe   :  { %309 = vst [vmem:[#allocation7 + $0x30] sm:$0xff] %v131_v8 }
  0xbf   :  { %v167_v10 = vpop.f32.mrf.mxu3  ;;  %310 = vst [vmem:[#allocation7 + $0x38] sm:$0xff] %v196_v9  ;;  %v261_v11 = vpop.f32.mrf.mxu2 }
  0xc0   :  { %345 = vst [vmem:[#allocation7 + $0x150] sm:$0xff] %v167_v10 }
  0xc1   :  { %311 = vst [vmem:[#allocation7 + $0x40] sm:$0xff] %v261_v11 }
  0xc5   :  { %v134_v12 = vpop.f32.mrf.mxu0  ;;  %v199_v13 = vpop.f32.mrf.mxu1 }
  0xc6   :  { %312 = vst [vmem:[#allocation7 + $0x48] sm:$0xff] %v134_v12 }
  0xc7   :  { %v170_v14 = vpop.f32.mrf.mxu3  ;;  %313 = vst [vmem:[#allocation7 + $0x50] sm:$0xff] %v199_v13  ;;  %v264_v15 = vpop.f32.mrf.mxu2 }
  0xc8   :  { %348 = vst [vmem:[#allocation7 + $0x168] sm:$0xff] %v170_v14 }
  0xc9   :  { %314 = vst [vmem:[#allocation7 + $0x58] sm:$0xff] %v264_v15 }
  0xcd   :  { %v137_v16 = vpop.f32.mrf.mxu0  ;;  %v202_v17 = vpop.f32.mrf.mxu1 }
  0xce   :  { %315 = vst [vmem:[#allocation7 + $0x60] sm:$0xff] %v137_v16 }
  0xcf   :  { %316 = vst [vmem:[#allocation7 + $0x68] sm:$0xff] %v202_v17  ;;  %v226_v18 = vpop.f32.mrf.mxu3  ;;  %v267_v19 = vpop.f32.mrf.mxu2 }
  0xd0   :  { %340 = vst [vmem:[#allocation7 + $0x128] sm:$0xff] %v226_v18 }
  0xd1   :  { %317 = vst [vmem:[#allocation7 + $0x70] sm:$0xff] %v267_v19 }
  0xd5   :  { %v140_v20 = vpop.f32.mrf.mxu0  ;;  %v205_v21 = vpop.f32.mrf.mxu1 }
  0xd6   :  { %318 = vst [vmem:[#allocation7 + $0x78] sm:$0xff] %v140_v20 }
  0xd7   :  { %319 = vst [vmem:[#allocation7 + $0x80] sm:$0xff] %v205_v21  ;;  %v229_v22 = vpop.f32.mrf.mxu3  ;;  %v270_v23 = vpop.f32.mrf.mxu2 }
  0xd8   :  { %343 = vst [vmem:[#allocation7 + $0x140] sm:$0xff] %v229_v22 }
  0xd9   :  { %320 = vst [vmem:[#allocation7 + $0x88] sm:$0xff] %v270_v23 }
  0xdd   :  { %v143_v24 = vpop.f32.mrf.mxu0  ;;  %v208_v25 = vpop.f32.mrf.mxu1 }
  0xde   :  { %321 = vst [vmem:[#allocation7 + $0x90] sm:$0xff] %v143_v24 }
  0xdf   :  { %322 = vst [vmem:[#allocation7 + $0x98] sm:$0xff] %v208_v25  ;;  %v232_v26 = vpop.f32.mrf.mxu3  ;;  %v273_v27 = vpop.f32.mrf.mxu2 }
  0xe0   :  { %346 = vst [vmem:[#allocation7 + $0x158] sm:$0xff] %v232_v26 }
  0xe1   :  { %323 = vst [vmem:[#allocation7 + $0xa0] sm:$0xff] %v273_v27 }
  0xe5   :  { %v146_v28 = vpop.f32.mrf.mxu0  ;;  %v211_v29 = vpop.f32.mrf.mxu1 }
  0xe6   :  { %324 = vst [vmem:[#allocation7 + $0xa8] sm:$0xff] %v146_v28 }
  0xe7   :  { %325 = vst [vmem:[#allocation7 + $0xb0] sm:$0xff] %v211_v29  ;;  %v235_v30 = vpop.f32.mrf.mxu3  ;;  %v276_v31 = vpop.f32.mrf.mxu2 }
  0xe8   :  { %349 = vst [vmem:[#allocation7 + $0x170] sm:$0xff] %v235_v30 }
  0xe9   :  { %326 = vst [vmem:[#allocation7 + $0xb8] sm:$0xff] %v276_v31 }
  0xed   :  { %v149_v32 = vpop.f32.mrf.mxu0  ;;  %v214_v33 = vpop.f32.mrf.mxu1 }
  0xee   :  { %327 = vst [vmem:[#allocation7 + $0xc0] sm:$0xff] %v149_v32 }
  0xef   :  { %328 = vst [vmem:[#allocation7 + $0xc8] sm:$0xff] %v214_v33  ;;  %v279_v34 = vpop.f32.mrf.mxu2  ;;  %v291_v35 = vpop.f32.mrf.mxu3 }
  0xf0   :  { %329 = vst [vmem:[#allocation7 + $0xd0] sm:$0xff] %v279_v34 }
  0xf1   :  { %341 = vst [vmem:[#allocation7 + $0x130] sm:$0xff] %v291_v35 }
  0xf5   :  { %v152_v36 = vpop.f32.mrf.mxu0  ;;  %v217_v37 = vpop.f32.mrf.mxu1 }
  0xf6   :  { %330 = vst [vmem:[#allocation7 + $0xd8] sm:$0xff] %v152_v36 }
  0xf7   :  { %331 = vst [vmem:[#allocation7 + $0xe0] sm:$0xff] %v217_v37  ;;  %v282_v38 = vpop.f32.mrf.mxu2  ;;  %v294_v39 = vpop.f32.mrf.mxu3 }
  0xf8   :  { %332 = vst [vmem:[#allocation7 + $0xe8] sm:$0xff] %v282_v38 }
  0xf9   :  { %344 = vst [vmem:[#allocation7 + $0x148] sm:$0xff] %v294_v39 }
  0xfd   :  { %v155_v40 = vpop.f32.mrf.mxu0  ;;  %v220_v41 = vpop.f32.mrf.mxu1 }
  0xfe   :  { %333 = vst [vmem:[#allocation7 + $0xf0] sm:$0xff] %v155_v40 }
  0xff   :  { %334 = vst [vmem:[#allocation7 + $0xf8] sm:$0xff] %v220_v41  ;;  %v285_v42 = vpop.f32.mrf.mxu2  ;;  %v297_v43 = vpop.f32.mrf.mxu3 }
 0x100   :  { %335 = vst [vmem:[#allocation7 + $0x100] sm:$0xff] %v285_v42 }
 0x101   :  { %347 = vst [vmem:[#allocation7 + $0x160] sm:$0xff] %v297_v43 }
 0x105   :  { %v158_v44 = vpop.f32.mrf.mxu0  ;;  %v223_v45 = vpop.f32.mrf.mxu1 }
 0x106   :  { %336 = vst [vmem:[#allocation7 + $0x108] sm:$0xff] %v158_v44 }
 0x107   :  { %337 = vst [vmem:[#allocation7 + $0x110] sm:$0xff] %v223_v45  ;;  %v288_v46 = vpop.f32.mrf.mxu2  ;;  %v300_v47 = vpop.f32.mrf.mxu3 }
 0x108   :  { %338 = vst [vmem:[#allocation7 + $0x118] sm:$0xff] %v288_v46 }
 0x109   :  { %350 = vst [vmem:[#allocation7 + $0x178] sm:$0xff] %v300_v47 }
 0x10a   :  { %363 = dma.vmem_to_hbm [thread:$0]  %s356_s1, 6144, %s358_s25, [#allocation4], %s508_s21, %s508_s21, %s509_s22  }
 0x10b   :  { %502 = dma.done.wait [#allocation4], 6144  }
 0x10c   :  { %503 = vsyncadd [#allocation4], 4294961152 }
 0x10d   :  { %368 = vsyncpa [#allocation3], 1 }
 0x10e   :  { %369 = vsyncpa [#allocation6], 1 }
 0x10f   :  { %370 = vsyncpa [#allocation4], 1 }

</bundles_post_ra>
